<compile_context>
chip_gen: v7x
topology: tpu7x:2x2x1
jax: 0.10.0
libtpu: 0.0.40
codegen_flags: <defaults>
</compile_context>

<pallas_src>
import functools

import jax
import jax.numpy as jnp
from jax.experimental import pallas as pl
from jax.experimental.pallas import tpu as pltpu


# ----------------------------- Pallas kernel -------------------------------

def res_block_kernel(x_ref, w1_ref, b1_ref, w2_ref, b2_ref, ws_ref, bs_ref,
                     o_ref, *, K, pad, TL, L):
    """Fused res_block for one (batch n, length-tile t) grid point.

    x_ref : (1, 1, C_in, TL + 4*pad)  bf16  x tile with halo (lanes = L axis)
    w*_ref: (C_*, K*C_in)             bf16  BN-scale-folded conv weights
    b*_ref: (C_*, 1)                  f32   folded conv-bias + BN bias
    o_ref : (1, C_out, TL)            f32   output tile (NCL layout)
    """
    TLh = TL + 2 * pad                         # h tile incl. conv2 halo
    t = pl.program_id(1)

    xh = x_ref[0, 0]                           # (C_in, TL + 4*pad) bf16

    # ---- conv1 -> BN -> ReLU (computed on tile + halo, kept in VMEM) ----
    xcol1 = jnp.concatenate([xh[:, k:k + TLh] for k in range(K)], axis=0)
    h = jnp.dot(w1_ref[...], xcol1, preferred_element_type=jnp.float32)
    h = jnp.maximum(h + b1_ref[...], 0.0)
    # zero halo positions that fall outside the true sequence [0, L): conv2's
    # "same" padding must see zeros there, not relu(bias).
    pos = t * TL - pad + jax.lax.broadcasted_iota(jnp.int32, (1, TLh), 1)
    h = jnp.where((pos >= 0) & (pos < L), h, 0.0)

    # ---- conv2(h) -> BN -> ReLU ----
    xcol2 = jnp.concatenate([h[:, k:k + TL] for k in range(K)],
                            axis=0).astype(jnp.bfloat16)
    y2 = jnp.dot(w2_ref[...], xcol2, preferred_element_type=jnp.float32)
    y2 = jnp.maximum(y2 + b2_ref[...], 0.0)

    # ---- shortcut(x) -> BN -> ReLU (reuses the x tile already in VMEM) ----
    xcols = jnp.concatenate([xh[:, pad + k:pad + k + TL] for k in range(K)],
                            axis=0)
    ys = jnp.dot(ws_ref[...], xcols, preferred_element_type=jnp.float32)
    ys = jnp.maximum(ys + bs_ref[...], 0.0)

    o_ref[0] = (y2 + ys).astype(o_ref.dtype)


# ------------------------------ JAX wrapper ---------------------------------

def _pick_tile(l, tile_l):
    """Tile length must divide L and be lane-aligned (or be all of L)."""
    if tile_l is not None and l % tile_l == 0 and (tile_l % 128 == 0 or tile_l == l):
        return tile_l
    return l


@functools.partial(jax.jit, static_argnames=("kernel_size", "tile_l"))
def res_block_forward(x, params, kernel_size, tile_l=128):
    """x: (N, C_in, L) f32 -> (N, C_out, L) f32.  Mirrors res_block.forward."""
    n, c_in, l = x.shape
    pad = kernel_size // 2
    (w1, b1), (w2, b2), (ws, bs) = params
    c_out = w2.shape[0]

    tl = _pick_tile(l, tile_l)
    n_lt = l // tl
    tlw = tl + 4 * pad

    # Per-tile x windows with a 2*pad halo, channels-first (lanes = L axis).
    xp = jnp.pad(x, ((0, 0), (0, 0), (2 * pad, 2 * pad))).astype(jnp.bfloat16)
    idx = jnp.arange(n_lt)[:, None] * tl + jnp.arange(tlw)[None, :]  # (n_lt, tlw)
    x_halo = jnp.transpose(xp[:, :, idx], (0, 2, 1, 3))              # (N, n_lt, C_in, tlw)

    kern = functools.partial(res_block_kernel, K=kernel_size, pad=pad, TL=tl, L=l)
    const = lambda i, j: (0, 0)                    # weights stay VMEM-resident
    return pl.pallas_call(
        kern,
        out_shape=jax.ShapeDtypeStruct((n, c_out, l), jnp.float32),
        grid_spec=pltpu.PrefetchScalarGridSpec(
            num_scalar_prefetch=0,
            grid=(n, n_lt),
            in_specs=[
                pl.BlockSpec((1, 1, c_in, tlw), lambda i, j: (i, j, 0, 0)),
                pl.BlockSpec(w1.shape, const), pl.BlockSpec(b1.shape, const),
                pl.BlockSpec(w2.shape, const), pl.BlockSpec(b2.shape, const),
                pl.BlockSpec(ws.shape, const), pl.BlockSpec(bs.shape, const),
            ],
            out_specs=pl.BlockSpec((1, c_out, tl), lambda i, j: (i, 0, j)),
        ),
        compiler_params=pltpu.CompilerParams(
            dimension_semantics=("parallel", "parallel")),
    )(x_halo, w1, b1, w2, b2, ws, bs)


# --------------------------- parameter creation ------------------------------

def fold_branch_params(w, conv_b, gamma, beta, r_mean, r_var, eps=1e-5):
    """Fold Conv1d bias + eval-mode BN into (bf16 weight matrix, f32 bias)."""
    c_out, c_in, k = w.shape
    scale = gamma / jnp.sqrt(r_var + eps)
    bias = beta + scale * (conv_b - r_mean)
    # columns ordered tap-major: col = k*C_in + c_in, matching in-kernel xcol
    w_mat = jnp.transpose(w, (0, 2, 1)).reshape(c_out, k * c_in)
    w_mat = (w_mat * scale[:, None]).astype(jnp.bfloat16)
    return w_mat, bias.reshape(c_out, 1).astype(jnp.float32)


def make_branch(key, c_in, c_out, kernel_size):
    kw, kb, kg, kbe, km, kv = jax.random.split(key, 6)
    w = 0.2 * jax.random.normal(kw, (c_out, c_in, kernel_size), jnp.float32)
    conv_b = 0.1 * jax.random.normal(kb, (c_out,), jnp.float32)
    gamma = 1.0 + 0.1 * jax.random.normal(kg, (c_out,), jnp.float32)
    beta = 0.1 * jax.random.normal(kbe, (c_out,), jnp.float32)
    r_mean = 0.1 * jax.random.normal(km, (c_out,), jnp.float32)
    r_var = 1.0 + 0.1 * jax.random.uniform(kv, (c_out,), jnp.float32)
    return fold_branch_params(w, conv_b, gamma, beta, r_mean, r_var)


# ------------------------------- reference -----------------------------------

def ref_branch(x_f32, w_mat_bf16, bias, kernel_size, pad):
    """Pure-JAX reference with the same bf16 operand rounding as the kernel."""
    w = w_mat_bf16.astype(jnp.float32)                    # (C_out, K*C_in)
    n, c_in, l = x_f32.shape
    xp = jnp.pad(x_f32, ((0, 0), (0, 0), (pad, pad)))
    cols = jnp.concatenate([xp[:, :, k:k + l] for k in range(kernel_size)],
                           axis=1)                        # (N, K*C_in, L)
    y = jnp.einsum('oc,ncl->nol', w, cols) + bias[None, :, :]
    return jnp.maximum(y, 0.0)


# --------------------------------- main ---------------------------------------

if __name__ == "__main__":
    N, C_IN, C_OUT, L, K = 2, 4, 8, 256, 3
    PAD = K // 2

    key = jax.random.PRNGKey(0)
    kx, k1, k2, ks = jax.random.split(key, 4)
    x = jax.random.normal(kx, (N, C_IN, L), jnp.float32)

    p1 = make_branch(k1, C_IN, C_IN, K)      # conv1: in_feature -> in_feature
    p2 = make_branch(k2, C_IN, C_OUT, K)     # conv2: in_feature -> out_feature
    ps = make_branch(ks, C_IN, C_OUT, K)     # shortcut

    out = res_block_forward(x, (p1, p2, ps), kernel_size=K, tile_l=128)
    out = jax.block_until_ready(out)
    assert out.shape == (N, C_OUT, L), out.shape

    # Full-forward pure-JAX reference (same bf16 rounding, f32 accumulation).
    xb = x.astype(jnp.bfloat16).astype(jnp.float32)
    h_ref = ref_branch(xb, p1[0], p1[1], K, PAD)
    h_ref = h_ref.astype(jnp.bfloat16).astype(jnp.float32)
    ref = (ref_branch(h_ref, p2[0], p2[1], K, PAD)
           + ref_branch(xb, ps[0], ps[1], K, PAD))

    err = float(jnp.max(jnp.abs(out - ref)))
    assert jnp.allclose(out, ref, rtol=2e-2, atol=2e-2), err

    print("KERNEL_OK")
</pallas_src>

<mosaic_0001>
module attributes {stable_mosaic.version = 11 : i64} {
  func.func @res_block_kernel(%arg0: i32, %arg1: i32, %arg2: memref<1x1x4x132xbf16, #tpu.memory_space<vmem>>, %arg3: memref<4x12xbf16, #tpu.memory_space<vmem>>, %arg4: memref<4x1xf32, #tpu.memory_space<vmem>>, %arg5: memref<8x12xbf16, #tpu.memory_space<vmem>>, %arg6: memref<8x1xf32, #tpu.memory_space<vmem>>, %arg7: memref<8x12xbf16, #tpu.memory_space<vmem>>, %arg8: memref<8x1xf32, #tpu.memory_space<vmem>>, %arg9: memref<1x8x128xf32, #tpu.memory_space<vmem>>) attributes {dimension_semantics = [#tpu.dimension_semantics<parallel>, #tpu.dimension_semantics<parallel>], iteration_bounds = array<i64: 2, 2>, scalar_prefetch = 0 : i64, scratch_operands = 0 : i64, tpu.core_type = #tpu.core_type<tc>, window_params = [{transform_indices = @transform_0, window_bounds = array<i64: 1, 1, 4, 132>}, {pipeline_mode = #tpu.pipeline_mode<synchronous>, transform_indices = @transform_1, window_bounds = array<i64: 4, 12>}, {pipeline_mode = #tpu.pipeline_mode<synchronous>, transform_indices = @transform_2, window_bounds = array<i64: 4, 1>}, {pipeline_mode = #tpu.pipeline_mode<synchronous>, transform_indices = @transform_3, window_bounds = array<i64: 8, 12>}, {pipeline_mode = #tpu.pipeline_mode<synchronous>, transform_indices = @transform_4, window_bounds = array<i64: 8, 1>}, {pipeline_mode = #tpu.pipeline_mode<synchronous>, transform_indices = @transform_5, window_bounds = array<i64: 8, 12>}, {pipeline_mode = #tpu.pipeline_mode<synchronous>, transform_indices = @transform_6, window_bounds = array<i64: 8, 1>}, {transform_indices = @transform_7, window_bounds = array<i64: 1, 8, 128>}]} {
    %c0 = arith.constant 0 : index
    %c0_0 = arith.constant 0 : index
    %c0_1 = arith.constant 0 : index
    %c0_2 = arith.constant 0 : index
    %0 = vector.load %arg2[%c0, %c0_0, %c0_1, %c0_2] : memref<1x1x4x132xbf16, #tpu.memory_space<vmem>>, vector<1x1x4x132xbf16>
    %1 = vector.shape_cast %0 : vector<1x1x4x132xbf16> to vector<4x132xbf16>
    %2 = vector.extract_strided_slice %1 {offsets = [0, 0], sizes = [4, 130], strides = [1, 1]} : vector<4x132xbf16> to vector<4x130xbf16>
    %3 = vector.extract_strided_slice %1 {offsets = [0, 1], sizes = [4, 130], strides = [1, 1]} : vector<4x132xbf16> to vector<4x130xbf16>
    %4 = vector.extract_strided_slice %1 {offsets = [0, 2], sizes = [4, 130], strides = [1, 1]} : vector<4x132xbf16> to vector<4x130xbf16>
    %5 = tpu.concatenate %2, %3, %4 in 0 : vector<4x130xbf16>, vector<4x130xbf16>, vector<4x130xbf16> -> vector<12x130xbf16>
    %c0_3 = arith.constant 0 : index
    %c0_4 = arith.constant 0 : index
    %6 = vector.load %arg3[%c0_3, %c0_4] : memref<4x12xbf16, #tpu.memory_space<vmem>>, vector<4x12xbf16>
    %cst = arith.constant dense<0.000000e+00> : vector<4x130xf32>
    %7 = tpu.matmul %6, %5, %cst {dimension_numbers = #tpu.dot_dimension_numbers<[1], [0], [0], [1], [0, 0, 1, 1], [], []>} : vector<4x12xbf16>, vector<12x130xbf16>, vector<4x130xf32> -> vector<4x130xf32>
    %c0_5 = arith.constant 0 : index
    %c0_6 = arith.constant 0 : index
    %8 = vector.load %arg4[%c0_5, %c0_6] : memref<4x1xf32, #tpu.memory_space<vmem>>, vector<4x1xf32>
    %9 = vector.broadcast %8 : vector<4x1xf32> to vector<4x130xf32>
    %10 = arith.addf %7, %9 : vector<4x130xf32>
    %cst_7 = arith.constant 0.000000e+00 : f32
    %11 = vector.broadcast %cst_7 : f32 to vector<4x130xf32>
    %12 = arith.maximumf %10, %11 : vector<4x130xf32>
    %c128_i32 = arith.constant 128 : i32
    %13 = arith.muli %arg1, %c128_i32 : i32
    %c1_i32 = arith.constant 1 : i32
    %14 = arith.subi %13, %c1_i32 : i32
    %15 = tpu.iota {dimensions = array<i32: 1>} : vector<1x130xi32>
    %16 = vector.broadcast %14 : i32 to vector<1x130xi32>
    %17 = arith.addi %16, %15 : vector<1x130xi32>
    %c0_i32 = arith.constant 0 : i32
    %18 = vector.broadcast %c0_i32 : i32 to vector<1x130xi32>
    %19 = arith.cmpi sge, %17, %18 : vector<1x130xi32>
    %c256_i32 = arith.constant 256 : i32
    %20 = vector.broadcast %c256_i32 : i32 to vector<1x130xi32>
    %21 = arith.cmpi slt, %17, %20 : vector<1x130xi32>
    %22 = arith.andi %19, %21 : vector<1x130xi1>
    %cst_8 = arith.constant 0.000000e+00 : f32
    %23 = vector.shape_cast %22 : vector<1x130xi1> to vector<1x130xi1>
    %24 = vector.broadcast %23 : vector<1x130xi1> to vector<4x130xi1>
    %25 = vector.broadcast %cst_8 : f32 to vector<4x130xf32>
    %26 = arith.select %24, %12, %25 : vector<4x130xi1>, vector<4x130xf32>
    %27 = vector.extract_strided_slice %26 {offsets = [0, 0], sizes = [4, 128], strides = [1, 1]} : vector<4x130xf32> to vector<4x128xf32>
    %28 = vector.extract_strided_slice %26 {offsets = [0, 1], sizes = [4, 128], strides = [1, 1]} : vector<4x130xf32> to vector<4x128xf32>
    %29 = vector.extract_strided_slice %26 {offsets = [0, 2], sizes = [4, 128], strides = [1, 1]} : vector<4x130xf32> to vector<4x128xf32>
    %30 = tpu.concatenate %27, %28, %29 in 0 : vector<4x128xf32>, vector<4x128xf32>, vector<4x128xf32> -> vector<12x128xf32>
    %31 = arith.truncf %30 : vector<12x128xf32> to vector<12x128xbf16>
    %c0_9 = arith.constant 0 : index
    %c0_10 = arith.constant 0 : index
    %32 = vector.load %arg5[%c0_9, %c0_10] : memref<8x12xbf16, #tpu.memory_space<vmem>>, vector<8x12xbf16>
    %cst_11 = arith.constant dense<0.000000e+00> : vector<8x128xf32>
    %33 = tpu.matmul %32, %31, %cst_11 {dimension_numbers = #tpu.dot_dimension_numbers<[1], [0], [0], [1], [0, 0, 1, 1], [], []>} : vector<8x12xbf16>, vector<12x128xbf16>, vector<8x128xf32> -> vector<8x128xf32>
    %c0_12 = arith.constant 0 : index
    %c0_13 = arith.constant 0 : index
    %34 = vector.load %arg6[%c0_12, %c0_13] : memref<8x1xf32, #tpu.memory_space<vmem>>, vector<8x1xf32>
    %35 = vector.broadcast %34 : vector<8x1xf32> to vector<8x128xf32>
    %36 = arith.addf %33, %35 : vector<8x128xf32>
    %cst_14 = arith.constant 0.000000e+00 : f32
    %37 = vector.broadcast %cst_14 : f32 to vector<8x128xf32>
    %38 = arith.maximumf %36, %37 : vector<8x128xf32>
    %39 = vector.extract_strided_slice %1 {offsets = [0, 1], sizes = [4, 128], strides = [1, 1]} : vector<4x132xbf16> to vector<4x128xbf16>
    %40 = vector.extract_strided_slice %1 {offsets = [0, 2], sizes = [4, 128], strides = [1, 1]} : vector<4x132xbf16> to vector<4x128xbf16>
    %41 = vector.extract_strided_slice %1 {offsets = [0, 3], sizes = [4, 128], strides = [1, 1]} : vector<4x132xbf16> to vector<4x128xbf16>
    %42 = tpu.concatenate %39, %40, %41 in 0 : vector<4x128xbf16>, vector<4x128xbf16>, vector<4x128xbf16> -> vector<12x128xbf16>
    %c0_15 = arith.constant 0 : index
    %c0_16 = arith.constant 0 : index
    %43 = vector.load %arg7[%c0_15, %c0_16] : memref<8x12xbf16, #tpu.memory_space<vmem>>, vector<8x12xbf16>
    %cst_17 = arith.constant dense<0.000000e+00> : vector<8x128xf32>
    %44 = tpu.matmul %43, %42, %cst_17 {dimension_numbers = #tpu.dot_dimension_numbers<[1], [0], [0], [1], [0, 0, 1, 1], [], []>} : vector<8x12xbf16>, vector<12x128xbf16>, vector<8x128xf32> -> vector<8x128xf32>
    %c0_18 = arith.constant 0 : index
    %c0_19 = arith.constant 0 : index
    %45 = vector.load %arg8[%c0_18, %c0_19] : memref<8x1xf32, #tpu.memory_space<vmem>>, vector<8x1xf32>
    %46 = vector.broadcast %45 : vector<8x1xf32> to vector<8x128xf32>
    %47 = arith.addf %44, %46 : vector<8x128xf32>
    %cst_20 = arith.constant 0.000000e+00 : f32
    %48 = vector.broadcast %cst_20 : f32 to vector<8x128xf32>
    %49 = arith.maximumf %47, %48 : vector<8x128xf32>
    %50 = arith.addf %38, %49 : vector<8x128xf32>
    %c0_21 = arith.constant 0 : index
    %c0_22 = arith.constant 0 : index
    %c0_23 = arith.constant 0 : index
    %51 = vector.load %arg9[%c0_21, %c0_22, %c0_23] : memref<1x8x128xf32, #tpu.memory_space<vmem>>, vector<1x8x128xf32>
    %52 = vector.shape_cast %51 : vector<1x8x128xf32> to vector<8x128xf32>
    %53 = vector.shape_cast %50 : vector<8x128xf32> to vector<1x8x128xf32>
    tpu.vector_store %arg9[%c0_21, %c0_22, %c0_23], %53 {strides = array<i32>} : memref<1x8x128xf32, #tpu.memory_space<vmem>>, vector<1x8x128xf32>,
    return
  }
  func.func @transform_0(%arg0: i32, %arg1: i32) -> (i32, i32, i32, i32) {
    %c0_i32 = arith.constant 0 : i32
    %c0_i32_0 = arith.constant 0 : i32
    %c0_i32_1 = arith.constant 0 : i32
    return %arg0, %arg1, %c0_i32, %c0_i32_0 : i32, i32, i32, i32
  }
  func.func @transform_1(%arg0: i32, %arg1: i32) -> (i32, i32) {
    %c0_i32 = arith.constant 0 : i32
    %c0_i32_0 = arith.constant 0 : i32
    %c0_i32_1 = arith.constant 0 : i32
    return %c0_i32, %c0_i32_0 : i32, i32
  }
  func.func @transform_2(%arg0: i32, %arg1: i32) -> (i32, i32) {
    %c0_i32 = arith.constant 0 : i32
    %c0_i32_0 = arith.constant 0 : i32
    %c0_i32_1 = arith.constant 0 : i32
    return %c0_i32, %c0_i32_0 : i32, i32
  }
  func.func @transform_3(%arg0: i32, %arg1: i32) -> (i32, i32) {
    %c0_i32 = arith.constant 0 : i32
    %c0_i32_0 = arith.constant 0 : i32
    %c0_i32_1 = arith.constant 0 : i32
    return %c0_i32, %c0_i32_0 : i32, i32
  }
  func.func @transform_4(%arg0: i32, %arg1: i32) -> (i32, i32) {
    %c0_i32 = arith.constant 0 : i32
    %c0_i32_0 = arith.constant 0 : i32
    %c0_i32_1 = arith.constant 0 : i32
    return %c0_i32, %c0_i32_0 : i32, i32
  }
  func.func @transform_5(%arg0: i32, %arg1: i32) -> (i32, i32) {
    %c0_i32 = arith.constant 0 : i32
    %c0_i32_0 = arith.constant 0 : i32
    %c0_i32_1 = arith.constant 0 : i32
    return %c0_i32, %c0_i32_0 : i32, i32
  }
  func.func @transform_6(%arg0: i32, %arg1: i32) -> (i32, i32) {
    %c0_i32 = arith.constant 0 : i32
    %c0_i32_0 = arith.constant 0 : i32
    %c0_i32_1 = arith.constant 0 : i32
    return %c0_i32, %c0_i32_0 : i32, i32
  }
  func.func @transform_7(%arg0: i32, %arg1: i32) -> (i32, i32, i32) {
    %c0_i32 = arith.constant 0 : i32
    %c0_i32_0 = arith.constant 0 : i32
    return %arg0, %c0_i32, %arg1 : i32, i32, i32
  }
}

</mosaic_0001>

<bundles_post_ra>
// kernel: res_block_forward.1
= control target key start
LH: loop header
LB: loop body
LE: loop exit
PB: predicated region body
PF: predicated region fallthrough
CT: control target
= control target key end

     0   :  { %12 = vsyncpa [#allocation3], 0  ;;  %s1111_s0 = inlined_call_operand.vmem [shape: bf16[2,2,4,132], index: 0, kind: input, shape index: {}]   ;;  %s1112_s1 = inlined_call_operand.vmem [shape: bf16[4,12], index: 1, kind: input, shape index: {}]   ;;  %s1113_s2 = inlined_call_operand.vmem [shape: f32[4,1], index: 2, kind: input, shape index: {}]   ;;  %s1114_s3 = inlined_call_operand.vmem [shape: bf16[8,12], index: 3, kind: input, shape index: {}]   ;;  %s1115_s4 = inlined_call_operand.vmem [shape: f32[8,1], index: 4, kind: input, shape index: {}]   ;;  %s1116_s5 = inlined_call_operand.vmem [shape: bf16[8,12], index: 5, kind: input, shape index: {}]   ;;  %s1117_s6 = inlined_call_operand.vmem [shape: f32[8,1], index: 6, kind: input, shape index: {}]   ;;  %s1118_s7 = inlined_call_operand.hbm [shape: f32[2,8,256], index: 7, kind: output, shape index: {}]  }
   0x1   :  { %14 = vsyncpa [#allocation3 + $0x1], 0  ;;  %s932_s24 = smov 0   ;;  %s934_s25 = smov 0  }
   0x2   :  { %s936_s26 = smov 0   ;;  %s938_s27 = smov 0  }
   0x3   :  { %s940_s28 = smov 0   ;;  %s942_s29 = smov 0  }
   0x4   :  { %s944_s30 = smov 0   ;;  %s946_s8 = smov 0  }
   0x5 LB: > { %s663_s9 = sadd.s32 4294967295, %s883_s8   ;;  %s664_s10 = sadd.s32 4294967294, %s883_s8   ;;  %s883_s8 = sphi %s946_s8, %s20_s8   ;;  %s879_s30 = sphi %s944_s30, %s1130_s30   ;;  %s875_s29 = sphi %s942_s29, %s1129_s29   ;;  %s871_s28 = sphi %s940_s28, %s1128_s28   ;;  %s867_s27 = sphi %s938_s27, %s1127_s27   ;;  %s863_s26 = sphi %s936_s26, %s1126_s26   ;;  %s859_s25 = sphi %s934_s25, %s1125_s25   ;;  %s855_s24 = sphi %s932_s24, %s1124_s24  }
   0x6   : > { %s29_s11 = sadd.s32 1, %s875_s29  ;;  %s32_s12 = sadd.s32 1, %s879_s30 }
   0x7   : > { %p30_p0 = scmp.ge.s32.totalorder %s29_s11, 2  ;;  %p205_p1 = scmp.ne.s32.totalorder %s863_s26, %s859_s25 }
   0x8   : > { %p206_p2 = scmp.eq.s32.totalorder %s663_s9, 3  ;;  %p211_p5 = scmp.ne.s32.totalorder %s859_s25, %s855_s24 }
   0x9   : > { %s1132_s11 = smov (%p30_p0, %s29_s11), 0  ;;  %s1134_s12 = smov (!%p30_p0, %s32_s12), %s879_s30 }
   0xa   : > { %s191_s13 = ssub.s32 %s875_s29, %s1132_s11  ;;  %p983_p3 = por %p206_p2, %p205_p1 }
   0xb   : > { %p34_p4 = scmp.ge.s32.totalorder %s1134_s12, 2  ;;  %p212_p6 = scmp.eq.s32.totalorder %s664_s10, 3 }
   0xc   : > { %p667_p7 = scmp.ge.s32.totalorder %s883_s8, 1  ;;  %p260_p9 = scmp.lt.s32.totalorder %s883_s8, 5 }
   0xd   : > { %s1136_s12 = smov (%p34_p4, %s1134_s12), 0  ;;  %p992_p8 = por %p212_p6, %p211_p5 }
   0xe   : > { %1121 = sst [smem:[#allocation5_spill]] %s1136_s12  ;;  %s190_s16 = ssub.s32 %s879_s30, %s1136_s12 }
   0xf   : > { %s195_s17 = sadd.s32 1, %s863_s26  ;;  %s192_s18 = sor.u32 %s191_s13, %s190_s16 }
  0x10   : > { %p261_p10 = pnand %p667_p7, %p260_p9  ;;  %p193_p11 = scmp.eq.s32.totalorder %s192_s18, 0 }
  0x11   : > { %p296_p12 = scmp.lt.s32.totalorder (!%p261_p10), %s871_s28, 1  ;;  %p298_p13 = scmp.lt.s32.totalorder (!%p261_p10), %s867_s27, 1  ;;  %v311_v0 = vlaneseq (!%p261_p10)  ;;  %v885_v1 = vmov (!%p261_p10), 1983009808   ;;  %v886_v3 = vmov (!%p261_p10), 0   ;;  %vm329_vm0 = vcmask (!%p261_p10), 1039360  }
  0x12   : > { %s1001_s19 = scalar_select %p193_p11, %s863_s26, %s195_s17  }
  0x13   : > { %264 = sbr.rel (%p261_p10) target bundleno = 745 (0x2e9), region = 48  ;;  %v309_v2 = vunpack.c.l.s4 (!%p261_p10), %v885_v1  ;;  %776 = vset.pattern.permute.xlu0 (!%p261_p10), %v886_v3  ;;  %398 = vmatprep.mubr.bf16.mxu0 (!%p261_p10), %v886_v3  ;;  %v312_v4 = vshrl.u32 (!%p261_p10), %v311_v0, 7  ;;  %s887_s18 = smov (!%p261_p10), 127   ;;  %v351_v13 = vld [vmem:[%s1113_s2] sm:$0xf] (!%p261_p10)  ;;  %vm338_vm1 = vcmask (!%p261_p10), 1041408  }
  0x14   : > { %787 = vset.pattern.permute.xlu1 (!%p261_p10), %v886_v3  ;;  %s888_s12 = smov (!%p261_p10), 126   ;;  %vm336_vm2 = vcmask (!%p261_p10), 1031168   ;;  %vm345_vm3 = vcmask (!%p261_p10), 1043456   ;;  %vm361_vm4 = vcmask (!%p261_p10), 1045504   ;;  %v350_v26 = vld [vmem:[%s1112_s1] sm:$0x3] (!%p261_p10) }
  0x15   : > { %v310_v5 = vunpack.c.0.s8 (!%p261_p10), %v309_v2  ;;  %vm357_vm5 = vcmask (!%p261_p10), 97280   ;;  %v450_v27 = vld [vmem:[%s1115_s4] sm:$0xff] (!%p261_p10)  ;;  %s674_s13 = sshll.u32 (!%p261_p10), %s867_s27, 7  ;;  %v412_v28 = vand.u32 (!%p261_p10), 127, %v311_v0  ;;  %v889_v43 = vmov (!%p261_p10), 0.0  }
  0x16   : > { %s675_s16 = sadd.s32 (!%p261_p10), 4294967295, %s674_s13  ;;  %687 = vmatprep.subr.bf16.mxu1 (!%p261_p10), %v889_v43  ;;  %vm890_vm12 = vmmov (!%p261_p10), 0   ;;  %v504_v49 = vld [vmem:[%s1117_s6] sm:$0xff] (!%p261_p10) }
  0x17   : > { %v313_v6 = vsub.s32 (!%p261_p10), %v310_v5, %v312_v4  ;;  %v414_v29 = vstv (!%p261_p10), %s675_s16  ;;  %v413_v30 = vadd.s32 (!%p261_p10), 128, %v412_v28  ;;  %689 = vmatprep.mubr.msk.bf16.mxu1 (!%p261_p10), %vm890_vm12, %v889_v43  ;;  %v503_v1 = vld [vmem:[%s1116_s5] sm:$0xf] (!%p261_p10) }
  0x18   : > { %v415_v31 = vadd.s32 (!%p261_p10), %v414_v29, %v412_v28  ;;  %v449_v2 = vld [vmem:[%s1114_s3] sm:$0xf] (!%p261_p10) }
  0x19   : > { %v416_v32 = vadd.s32 (!%p261_p10), %v414_v29, %v413_v30 }
  0x1a   : > { %s297_s20 = scalar_select %p296_p12, %s871_s28, 1  ;;  %vm417_vm6 = vcmp.ge.s32.totalorder %v415_v31, 0  ;;  %vm419_vm7 = vcmp.lt.s32.totalorder %v415_v31, 256 }
  0x1b   : > { %s299_s21 = scalar_select %p298_p13, %s867_s27, 1  ;;  %vm418_vm8 = vcmp.ge.s32.totalorder %v416_v32, 0  ;;  %vm420_vm9 = vcmp.lt.s32.totalorder %v416_v32, 256  ;;  %vm421_vm10 = vmand %vm417_vm6, %vm419_vm7 }
  0x1c   : > { %s670_s22 = sshll.u32 %s297_s20, 2  ;;  %vm422_vm11 = vmand %vm418_vm8, %vm420_vm9 }
  0x1d   : > { %s669_s23 = sshll.u32 %s299_s21, 1 }
  0x1e   : > { %s302_s9 = sadd.s32 %s670_s22, %s669_s23  ;;  %s293_s23 = sand.u32 1, %s859_s25  }
  0x1f   : > { %s671_s10 = sshll.u32 %s302_s9, 1  ;;  %s668_s9 = sshll.u32 %s293_s23, 3 }
  0x20   : > { %s304_s17 = scalar_lea.vmem %s1111_s0, %s671_s10  ;;  %s679_s10 = sshll.u32 %s871_s28, 1 }
  0x21   : > { %v306_v7 = vld [vmem:[%s304_s17] sm:$0xf]  ;;  %s578_s13 = sadd.s32 %s867_s27, %s679_s10  ;;  %s295_s17 = scalar_lea.vmem [#allocation2], %s668_s9 }
  0x22   : > { %v316_v8 = vcombine.low %v306_v7, %v306_v7  ;;  %v314_v9 = vrot.slane %v306_v7, %v313_v6  ;;  %s680_s16 = sshll.u32 %s578_s13, 7  ;;  %s582_s20 = sshll.u32 %s295_s17, 4  ;;  %s1060_s20 = int_to_ptr.vmem [resolvable:$true] %s582_s20 }
  0x23   : > { %s1058_s27 = scalar_lea.hbm %s1118_s7, %s680_s16  ;;  %s789_s21 = scalar_lea.vmem %s1060_s20, 128 }
  0x24   : > { %v323_v10 = vrot.slane %v316_v8, %v313_v6  ;;  %v331_v11 = vcombine.low %v314_v9, %v314_v9  ;;  %v315_v16 = vcombine.high %v314_v9, %v314_v9  ;;  %p790_p0 = scmp.ne.s32.totalorder %s1060_s20, %s789_s21  ;;  %s891_s22 = smov [#allocation2]  }
  0x25   : > { %s793_s9 = sshll.u32 %s891_s22, 4  ;;  %s794_s9 = int_to_ptr.vmem [resolvable:$false] %s793_s9 }
  0x26   : > { %325 = vrot.lane.b32.xlu0 %v323_v10, %s887_s18  ;;  %v324_v12 = vcombine.high %v323_v10, %v323_v10  ;;  %332 = vrot.lane.b32.xlu1 %v331_v11, %s888_s12  ;;  %p791_p1 = pnand %p790_p0, %p983_p3  ;;  %s795_s10 = scalar_lea.vmem %s794_s9, 256 }
  0x27   : > { %p796_p4 = scmp.lt.s32.totalorder %s1060_s20, %s794_s9  ;;  %p797_p5 = scmp.lt.s32.totalorder %s795_s10, %s789_s21 }
  0x28   : > { %p792_p2 = pneg %p791_p1 }
  0x29   : > { %p798_p6 = por %p797_p5, %p796_p4 }
  0x2a   : > { %327 = vrot.lane.b32.xlu0 %v324_v12, %s887_s18  ;;  %334 = vrot.lane.b32.xlu1 %v314_v9, %s888_s12 }
  0x2b   : > { %p799_p7 = pnand %p798_p6, %p792_p2 }
  0x2e   : > { %354 = vperm.xlu0 %776, %v351_v13  }
  0x98   : > { %v326_v14 = vpop.permute.xlu0 %325  ;;  %v333_v15 = vpop.permute.xlu1 %332 }
  0x9c   : > { %v328_v17 = vpop.permute.xlu0 %327  ;;  %v335_v18 = vpop.permute.xlu1 %334 }
  0x9d   : > { %v330_v19 = vsel %vm329_vm0, %v326_v14, %v328_v17  ;;  %v344_v20 = vsel %vm338_vm1, %v315_v16, %v328_v17  ;;  %v337_v21 = vsel %vm336_vm2, %v333_v15, %v335_v18 }
  0x9e   : > { %v349_v22 = vsel %vm345_vm3, %v344_v20, %v335_v18  ;;  %v341_v23 = vsel %vm338_vm1, %v314_v9, %v330_v19 }
  0x9f   : > { %672 = vmatprep.subr.msk.bf16.mxu0 %vm361_vm4, %v349_v22  ;;  %v347_v24 = vsel %vm345_vm3, %v341_v23, %v337_v21 }
  0xa0   : > { %512 = vrot.lane.b32.xlu0 %v347_v24, %s887_s18  ;;  %v362_v25 = vsel %vm361_vm4, %v347_v24, 0 }
  0xa1   : > { %367 = vmatpush1.bf16.msra.mxu0 %v362_v25 }
  0xa2   : > { %693 = vmatprep.subr.bf16.mxu0 %v889_v43 }
  0xa4   : > { %673 = vmatmul.mubr.msk.bf16.vlgmr.msra.gmra.mrb[0].mxu0 %vm357_vm5, %v350_v26  ;;  %453 = vperm.xlu0 %776, %v450_v27  }
  0xa5   : > { %695 = vmatprep.mubr.msk.bf16.mxu0 %vm890_vm12, %v889_v43 }
  0xad   : > { %v355_v33 = vpop.permute.xlu0 %354 }
 0x112   : > { %v513_v57 = vpop.permute.xlu0 %512 }
 0x123   : > { %v454_v4 = vpop.permute.xlu0 %453 }
 0x177   : > { %v400_v34 = vpop.f32.mrb[0].mxu0 }
 0x178   : > { %v401_v35 = vadd.f32 %v400_v34, %v355_v33  ;;  %v402_v36 = vpop.f32.mrb[1].mxu0 }
 0x179   : > { %v403_v37 = vadd.f32 %v402_v36, %v355_v33  ;;  %v404_v38 = vpop.f32.mrb[2].mxu0 }
 0x17a   : > { %v407_v39 = vmax.f32 %v401_v35, 0.0  ;;  %v405_v40 = vpop.f32.mrb[3].mxu0 }
 0x17b   : > { %v408_v41 = vmax.f32 %v403_v37, 0.0 }
 0x17c   : > { %v427_v42 = vsel %vm421_vm10, %v407_v39, 0.0 }
 0x17d   : > { %v428_v44 = vsel %vm422_vm11, %v408_v41, 0.0  ;;  %v431_v45 = vrot.slane %v427_v42, 4 }
 0x17e   : > { %v432_v46 = vrot.slane %v428_v44, 4  ;;  %v777_v47 = vpack.i.bf16 %v428_v44, %v427_v42 }
 0x180   : > { %778 = vrot.lane.b32.xlu1 %v777_v47, %s888_s12  ;;  %v782_v48 = vpack.i.bf16 %v432_v46, %v431_v45 }
 0x184   : > { %783 = vrot.lane.b32.xlu1 %v782_v48, %s887_s18 }
 0x188   : > { %514 = vrot.lane.b32.xlu1 %v349_v22, %s887_s18  ;;  %s567_s18 = scalar_lea.sflag [#allocation3], %s293_s23 }
 0x18c   : > { %507 = vperm.xlu1 %787, %v504_v49  }
 0x1f2   : > { %v779_v50 = vpop.permute.xlu1 %778 }
 0x1f3   : > { %v781_v51 = vunpack.i.h.bf16 %v779_v50  ;;  %v780_v52 = vunpack.i.l.bf16 %v779_v50 }
 0x1f5   : > { %v445_v59 = vsel %vm336_vm2, %v780_v52, %v781_v51 }
 0x1f6   : > { %v784_v53 = vpop.permute.xlu1 %783 }
 0x1f7   : > { %v786_v54 = vunpack.i.h.bf16 %v784_v53  ;;  %v785_v55 = vunpack.i.l.bf16 %v784_v53 }
 0x1f9   : > { %v438_v56 = vsel %vm329_vm0, %v785_v55, %v786_v54 }
 0x1fa   : > { %v515_v58 = vpop.permute.xlu1 %514  ;;  %v447_v60 = vsel %vm345_vm3, %v427_v42, %v438_v56 }
 0x1fb   : > { %v516_v61 = vsel %vm329_vm0, %v513_v57, %v515_v58  ;;  %v448_v62 = vpack.c.bf16 %v445_v59, %v447_v60 }
 0x1fc   : > { %v521_v63 = vsel %vm361_vm4, %v516_v61, 0 }
 0x1fd   : > { %694 = vmatpush3.bf16.msra.mxu0 %v521_v63  ;;  %v460_v0 = vsel %vm361_vm4, %v448_v62, 0 }
 0x1fe   : > { %688 = vmatpush3.bf16.msra.mxu1 %v460_v0 }
 0x200   : > { %696 = vmatmul.mubr.msk.bf16.vlgmr.msra.gmra.mrb[4].mxu0 %vm357_vm5, %v503_v1 }
 0x201   : > { %690 = vmatmul.mubr.msk.bf16.vlgmr.msra.gmra.mrb[0].mxu1 %vm357_vm5, %v449_v2 }
 0x20b   : > { %v508_v3 = vpop.permute.xlu1 %507 }
 0x2d3   : > { %v557_v5 = vpop.f32.mrb[4].mxu0 }
 0x2d4   : > { %v558_v6 = vadd.f32 %v557_v5, %v508_v3  ;;  %v496_v7 = vpop.f32.mrb[0].mxu1  ;;  %v697_v8 = vpop.f32.mrb[5].mxu0 }
 0x2d5   : > { %v497_v9 = vadd.f32 %v496_v7, %v454_v4  ;;  %v691_v10 = vpop.f32.mrb[1].mxu1  ;;  %v560_v11 = vpop.f32.mrb[6].mxu0 }
 0x2d6   : > { %v563_v12 = vmax.f32 %v558_v6, 0.0  ;;  %v499_v13 = vpop.f32.mrb[2].mxu1  ;;  %v698_v14 = vpop.f32.mrb[7].mxu0 }
 0x2d7   : > { %v502_v15 = vmax.f32 %v497_v9, 0.0  ;;  %v692_v16 = vpop.f32.mrb[3].mxu1 }
 0x2d9   : > { %v564_v17 = vadd.f32 %v563_v12, %v502_v15 }
 0x2db   : > { %565 = vst [vmem:[%s295_s17] sm:$0xff] %v564_v17 }
 0x2dc   : > { %802 = shalt.err (!%p799_p7)
}
 0x2dd   : > { %s803_s23 = scalar_lea.hbm %s1058_s27, 128  ;;  %s807_s17 = scalar_lea.hbm %s1118_s7, 512 }
 0x2de   : > { %p804_p9 = scmp.ne.s32.totalorder %s1058_s27, %s803_s23  ;;  %p808_p12 = scmp.lt.u32.totalorder %s1058_s27, %s1118_s7 }
 0x2df   : > { %p809_p13 = scmp.lt.u32.totalorder %s807_s17, %s803_s23  ;;  %p811_p1 = scmp.lt.u32.totalorder %s803_s23, %s1058_s27 }
 0x2e0   : > { %p805_p10 = pnand %p804_p9, %p983_p3 }
 0x2e1   : > { %p810_p0 = por %p809_p13, %p808_p12 }
 0x2e2   : > { %p806_p11 = pneg %p805_p10 }
 0x2e3   : > { %p812_p2 = por %p811_p1, %p810_p0 }
 0x2e5   : > { %p813_p4 = pnand %p812_p2, %p806_p11 }
 0x2e7   : > { %816 = shalt.err (!%p813_p4)
}
 0x2e8   : > { %699 = dma.vmem_to_hbm [thread:$0]  (%p983_p3), %s1060_s20, 128, %s1058_s27, %s567_s18  }
 0x2e9 PF: > { %p705_p5 = scmp.ge.s32.totalorder %s883_s8, 2  ;;  %s594_s21 = sand.u32 1, %s855_s24  }
 0x2ea   : > { %s595_s22 = scalar_lea.sflag [#allocation3], %s594_s21 }
 0x2eb   : > { %p702_p6 = pnand %p705_p5, %p992_p8 }
 0x2ed   : > { %850 = dma.done.wait (!%p702_p6), %s595_s22, 128  }
 0x2ee   : > { %852 = vsyncadd (!%p702_p6), %s595_s22, 4294967168  ;;  %s20_s8 = sadd.s32 1, %s883_s8   ;;  %s1123_s14 = sld [smem:[#allocation5_spill]] }
 0x2ef   : > { %p17_p7 = scmp.ge.s32.totalorder %s20_s8, 6   ;;  %s1124_s24 = smov %s859_s25 }
 0x2f0   : > { %s1125_s25 = smov %s863_s26  ;;  %s1126_s26 = smov %s1001_s19 }
 0x2f1   : > { %s1127_s27 = smov %s875_s29  ;;  %s1128_s28 = smov %s879_s30 }
 0x2f2   : > { %s1129_s29 = smov %s1132_s11  ;;  %19 = sbr.rel (!%p17_p7) target bundleno = 5 (0x5), region = 83 }
 0x2f4   : > { %s1130_s30 = smov %s1123_s14 }
 0x2f9   :  { %600 = vsyncpa [#allocation3], 1 }
 0x2fa   :  { %602 = vsyncpa [#allocation3 + $0x1], 1 }

</bundles_post_ra>
